<compile_context>
chip_gen: v6e
topology: v6e:2x2x1
jax: 0.10.0
libtpu: 0.0.40
codegen_flags: <defaults>
</compile_context>

<pallas_src>
from functools import partial

import jax
import jax.numpy as jnp
import numpy as np
from jax.experimental import pallas as pl
from jax.experimental.pallas import tpu as pltpu


def _round_up(x, m):
    return ((x + m - 1) // m) * m


def _pad2(a, shape):
    """Zero-pad a 2-D array up to `shape` (no-op if already that shape)."""
    if tuple(a.shape) == tuple(shape):
        return a
    return jnp.zeros(shape, a.dtype).at[: a.shape[0], : a.shape[1]].set(a)


# ---------------------------------------------------------------------------
# Fused MLP kernel: (tm, D) x2 inputs -> 512 -> 256 -> Np, all in VMEM.
# ---------------------------------------------------------------------------
def _mlp_kernel(x1_ref, x2_ref, w1a_ref, w1b_ref, b1_ref,
                w2_ref, b2_ref, w3_ref, b3_ref, o_ref):
    # Layer 1 — implicit concat: cat(x1, x2) @ W1 = x1 @ W1[:D] + x2 @ W1[D:]
    h = jnp.dot(x1_ref[...], w1a_ref[...], preferred_element_type=jnp.float32)
    h = h + jnp.dot(x2_ref[...], w1b_ref[...], preferred_element_type=jnp.float32)
    h = jnp.maximum(h + b1_ref[...], 0.0)
    # Layer 2
    h = jnp.dot(h, w2_ref[...], preferred_element_type=jnp.float32) + b2_ref[...]
    h = jnp.maximum(h, 0.0)
    # Layer 3 (no activation)
    o = jnp.dot(h, w3_ref[...], preferred_element_type=jnp.float32) + b3_ref[...]
    o_ref[...] = o.astype(o_ref.dtype)


def inverse_predictor_forward(obs_latent, obs_latent_next, params, tm=256):
    """obs_latent, obs_latent_next: (B, frames_stack*features_dim) f32."""
    B, D = obs_latent.shape
    w1, b1 = params["w1"], params["b1"]      # (2D, 512), (512,)
    w2, b2 = params["w2"], params["b2"]      # (512, 256), (256,)
    w3, b3 = params["w3"], params["b3"]      # (256, n_out), (n_out,)
    H1 = w1.shape[1]
    H2 = w2.shape[1]
    N = w3.shape[1]

    # Lane-align the contraction (D) and output (N) dims; H1/H2 are already 128-multiples.
    Dp = _round_up(D, 128)
    Np = _round_up(N, 128)
    tm = min(tm, _round_up(B, 8))
    Mp = _round_up(B, tm)

    f32 = jnp.float32
    x1 = _pad2(obs_latent.astype(f32), (Mp, Dp))
    x2 = _pad2(obs_latent_next.astype(f32), (Mp, Dp))
    w1a = _pad2(w1[:D].astype(f32), (Dp, H1))
    w1b = _pad2(w1[D:].astype(f32), (Dp, H1))
    w3p = _pad2(w3.astype(f32), (H2, Np))
    b1r = b1.astype(f32).reshape(1, H1)
    b2r = b2.astype(f32).reshape(1, H2)
    b3r = _pad2(b3.astype(f32).reshape(1, N), (1, Np))

    out = pl.pallas_call(
        _mlp_kernel,
        out_shape=jax.ShapeDtypeStruct((Mp, Np), f32),
        grid_spec=pltpu.PrefetchScalarGridSpec(
            num_scalar_prefetch=0,
            grid=(Mp // tm,),
            in_specs=[
                pl.BlockSpec((tm, Dp), lambda i: (i, 0)),   # x1 tile
                pl.BlockSpec((tm, Dp), lambda i: (i, 0)),   # x2 tile
                pl.BlockSpec((Dp, H1), lambda i: (0, 0)),   # W1 (first half)  — VMEM resident
                pl.BlockSpec((Dp, H1), lambda i: (0, 0)),   # W1 (second half) — VMEM resident
                pl.BlockSpec((1, H1), lambda i: (0, 0)),    # b1
                pl.BlockSpec((H1, H2), lambda i: (0, 0)),   # W2
                pl.BlockSpec((1, H2), lambda i: (0, 0)),    # b2
                pl.BlockSpec((H2, Np), lambda i: (0, 0)),   # W3 (lane-padded)
                pl.BlockSpec((1, Np), lambda i: (0, 0)),    # b3 (lane-padded)
            ],
            out_specs=pl.BlockSpec((tm, Np), lambda i: (i, 0)),
        ),
        compiler_params=pltpu.CompilerParams(
            dimension_semantics=("parallel",),
            vmem_limit_bytes=64 * 1024 * 1024,
        ),
    )(x1, x2, w1a, w1b, b1r, w2.astype(f32), b2r, w3p, b3r)

    return out[:B, :N]


# ---------------------------------------------------------------------------
# Parameter init (PyTorch nn.Linear default: U(-1/sqrt(fan_in), 1/sqrt(fan_in)))
# Weights stored as (in, out) so the kernel does x @ W directly.
# ---------------------------------------------------------------------------
def init_params(key, features_dim, frames_stack, batch_size):
    def make(key, fan_in, fan_out):
        kw, kb = jax.random.split(key)
        bound = 1.0 / np.sqrt(fan_in)
        w = jax.random.uniform(kw, (fan_in, fan_out), jnp.float32, -bound, bound)
        b = jax.random.uniform(kb, (fan_out,), jnp.float32, -bound, bound)
        return w, b

    d_in = 2 * frames_stack * features_dim
    k1, k2, k3 = jax.random.split(key, 3)
    w1, b1 = make(k1, d_in, 512)
    w2, b2 = make(k2, 512, 256)
    w3, b3 = make(k3, 256, batch_size)
    return dict(w1=w1, b1=b1, w2=w2, b2=b2, w3=w3, b3=b3)


# ---------------------------------------------------------------------------
# Pure-JAX reference (correctness check only)
# ---------------------------------------------------------------------------
def _ref_forward(obs_latent, obs_latent_next, params):
    x = jnp.concatenate([obs_latent, obs_latent_next], axis=1)
    h = jax.nn.relu(x @ params["w1"] + params["b1"])
    h = jax.nn.relu(h @ params["w2"] + params["b2"])
    return h @ params["w3"] + params["b3"]


if __name__ == "__main__":
    key = jax.random.PRNGKey(0)
    kp, ka, kb = jax.random.split(key, 3)

    features_dim = 32
    frames_stack = 4
    batch_size = 8          # also the output dim of the last Linear, per the module spec
    B = batch_size
    D = frames_stack * features_dim   # per-observation latent width

    params = init_params(kp, features_dim, frames_stack, batch_size)
    obs_latent = jax.random.normal(ka, (B, D), dtype=jnp.float32)
    obs_latent_next = jax.random.normal(kb, (B, D), dtype=jnp.float32)

    out = inverse_predictor_forward(obs_latent, obs_latent_next, params)
    out = jax.block_until_ready(out)
    assert out.shape == (B, batch_size), out.shape

    ref = jax.block_until_ready(_ref_forward(obs_latent, obs_latent_next, params))
    np.testing.assert_allclose(np.asarray(out), np.asarray(ref), rtol=2e-3, atol=2e-3)

    print("KERNEL_OK")
</pallas_src>

<mosaic_0001>
module attributes {stable_mosaic.version = 11 : i64} {
  func.func @_mlp_kernel(%arg0: i32, %arg1: memref<8x128xf32, #tpu.memory_space<vmem>>, %arg2: memref<8x128xf32, #tpu.memory_space<vmem>>, %arg3: memref<128x512xf32, #tpu.memory_space<vmem>>, %arg4: memref<128x512xf32, #tpu.memory_space<vmem>>, %arg5: memref<1x512xf32, #tpu.memory_space<vmem>>, %arg6: memref<512x256xf32, #tpu.memory_space<vmem>>, %arg7: memref<1x256xf32, #tpu.memory_space<vmem>>, %arg8: memref<256x128xf32, #tpu.memory_space<vmem>>, %arg9: memref<1x128xf32, #tpu.memory_space<vmem>>, %arg10: memref<8x128xf32, #tpu.memory_space<vmem>>) attributes {dimension_semantics = [#tpu.dimension_semantics<parallel>], iteration_bounds = array<i64: 1>, scalar_prefetch = 0 : i64, scratch_operands = 0 : i64, tpu.core_type = #tpu.core_type<tc>, window_params = [{transform_indices = @transform_0, window_bounds = array<i64: 8, 128>}, {transform_indices = @transform_1, window_bounds = array<i64: 8, 128>}, {pipeline_mode = #tpu.pipeline_mode<synchronous>, transform_indices = @transform_2, window_bounds = array<i64: 128, 512>}, {pipeline_mode = #tpu.pipeline_mode<synchronous>, transform_indices = @transform_3, window_bounds = array<i64: 128, 512>}, {pipeline_mode = #tpu.pipeline_mode<synchronous>, transform_indices = @transform_4, window_bounds = array<i64: 1, 512>}, {pipeline_mode = #tpu.pipeline_mode<synchronous>, transform_indices = @transform_5, window_bounds = array<i64: 512, 256>}, {pipeline_mode = #tpu.pipeline_mode<synchronous>, transform_indices = @transform_6, window_bounds = array<i64: 1, 256>}, {pipeline_mode = #tpu.pipeline_mode<synchronous>, transform_indices = @transform_7, window_bounds = array<i64: 256, 128>}, {pipeline_mode = #tpu.pipeline_mode<synchronous>, transform_indices = @transform_8, window_bounds = array<i64: 1, 128>}, {transform_indices = @transform_9, window_bounds = array<i64: 8, 128>}]} {
    %c0 = arith.constant 0 : index
    %c0_0 = arith.constant 0 : index
    %0 = vector.load %arg1[%c0, %c0_0] : memref<8x128xf32, #tpu.memory_space<vmem>>, vector<8x128xf32>
    %c0_1 = arith.constant 0 : index
    %c0_2 = arith.constant 0 : index
    %1 = vector.load %arg3[%c0_1, %c0_2] : memref<128x512xf32, #tpu.memory_space<vmem>>, vector<128x512xf32>
    %cst = arith.constant dense<0.000000e+00> : vector<8x512xf32>
    %2 = tpu.matmul %0, %1, %cst {dimension_numbers = #tpu.dot_dimension_numbers<[1], [0], [0], [1], [0, 0, 1, 1], [], []>} : vector<8x128xf32>, vector<128x512xf32>, vector<8x512xf32> -> vector<8x512xf32>
    %c0_3 = arith.constant 0 : index
    %c0_4 = arith.constant 0 : index
    %3 = vector.load %arg2[%c0_3, %c0_4] : memref<8x128xf32, #tpu.memory_space<vmem>>, vector<8x128xf32>
    %c0_5 = arith.constant 0 : index
    %c0_6 = arith.constant 0 : index
    %4 = vector.load %arg4[%c0_5, %c0_6] : memref<128x512xf32, #tpu.memory_space<vmem>>, vector<128x512xf32>
    %cst_7 = arith.constant dense<0.000000e+00> : vector<8x512xf32>
    %5 = tpu.matmul %3, %4, %cst_7 {dimension_numbers = #tpu.dot_dimension_numbers<[1], [0], [0], [1], [0, 0, 1, 1], [], []>} : vector<8x128xf32>, vector<128x512xf32>, vector<8x512xf32> -> vector<8x512xf32>
    %6 = arith.addf %2, %5 : vector<8x512xf32>
    %c0_8 = arith.constant 0 : index
    %c0_9 = arith.constant 0 : index
    %7 = vector.load %arg5[%c0_8, %c0_9] : memref<1x512xf32, #tpu.memory_space<vmem>>, vector<1x512xf32>
    %8 = vector.broadcast %7 : vector<1x512xf32> to vector<8x512xf32>
    %9 = arith.addf %6, %8 : vector<8x512xf32>
    %cst_10 = arith.constant 0.000000e+00 : f32
    %10 = vector.broadcast %cst_10 : f32 to vector<8x512xf32>
    %11 = arith.maximumf %9, %10 : vector<8x512xf32>
    %c0_11 = arith.constant 0 : index
    %c0_12 = arith.constant 0 : index
    %12 = vector.load %arg6[%c0_11, %c0_12] : memref<512x256xf32, #tpu.memory_space<vmem>>, vector<512x256xf32>
    %cst_13 = arith.constant dense<0.000000e+00> : vector<8x256xf32>
    %13 = tpu.matmul %11, %12, %cst_13 {dimension_numbers = #tpu.dot_dimension_numbers<[1], [0], [0], [1], [0, 0, 1, 1], [], []>} : vector<8x512xf32>, vector<512x256xf32>, vector<8x256xf32> -> vector<8x256xf32>
    %c0_14 = arith.constant 0 : index
    %c0_15 = arith.constant 0 : index
    %14 = vector.load %arg7[%c0_14, %c0_15] : memref<1x256xf32, #tpu.memory_space<vmem>>, vector<1x256xf32>
    %15 = vector.broadcast %14 : vector<1x256xf32> to vector<8x256xf32>
    %16 = arith.addf %13, %15 : vector<8x256xf32>
    %cst_16 = arith.constant 0.000000e+00 : f32
    %17 = vector.broadcast %cst_16 : f32 to vector<8x256xf32>
    %18 = arith.maximumf %16, %17 : vector<8x256xf32>
    %c0_17 = arith.constant 0 : index
    %c0_18 = arith.constant 0 : index
    %19 = vector.load %arg8[%c0_17, %c0_18] : memref<256x128xf32, #tpu.memory_space<vmem>>, vector<256x128xf32>
    %cst_19 = arith.constant dense<0.000000e+00> : vector<8x128xf32>
    %20 = tpu.matmul %18, %19, %cst_19 {dimension_numbers = #tpu.dot_dimension_numbers<[1], [0], [0], [1], [0, 0, 1, 1], [], []>} : vector<8x256xf32>, vector<256x128xf32>, vector<8x128xf32> -> vector<8x128xf32>
    %c0_20 = arith.constant 0 : index
    %c0_21 = arith.constant 0 : index
    %21 = vector.load %arg9[%c0_20, %c0_21] : memref<1x128xf32, #tpu.memory_space<vmem>>, vector<1x128xf32>
    %22 = vector.broadcast %21 : vector<1x128xf32> to vector<8x128xf32>
    %23 = arith.addf %20, %22 : vector<8x128xf32>
    %c0_22 = arith.constant 0 : index
    %c0_23 = arith.constant 0 : index
    %24 = vector.load %arg10[%c0_22, %c0_23] : memref<8x128xf32, #tpu.memory_space<vmem>>, vector<8x128xf32>
    tpu.vector_store %arg10[%c0_22, %c0_23], %23 {strides = array<i32>} : memref<8x128xf32, #tpu.memory_space<vmem>>, vector<8x128xf32>,
    return
  }
  func.func @transform_0(%arg0: i32) -> (i32, i32) {
    %c0_i32 = arith.constant 0 : i32
    %c0_i32_0 = arith.constant 0 : i32
    return %arg0, %c0_i32 : i32, i32
  }
  func.func @transform_1(%arg0: i32) -> (i32, i32) {
    %c0_i32 = arith.constant 0 : i32
    %c0_i32_0 = arith.constant 0 : i32
    return %arg0, %c0_i32 : i32, i32
  }
  func.func @transform_2(%arg0: i32) -> (i32, i32) {
    %c0_i32 = arith.constant 0 : i32
    %c0_i32_0 = arith.constant 0 : i32
    %c0_i32_1 = arith.constant 0 : i32
    return %c0_i32, %c0_i32_0 : i32, i32
  }
  func.func @transform_3(%arg0: i32) -> (i32, i32) {
    %c0_i32 = arith.constant 0 : i32
    %c0_i32_0 = arith.constant 0 : i32
    %c0_i32_1 = arith.constant 0 : i32
    return %c0_i32, %c0_i32_0 : i32, i32
  }
  func.func @transform_4(%arg0: i32) -> (i32, i32) {
    %c0_i32 = arith.constant 0 : i32
    %c0_i32_0 = arith.constant 0 : i32
    %c0_i32_1 = arith.constant 0 : i32
    return %c0_i32, %c0_i32_0 : i32, i32
  }
  func.func @transform_5(%arg0: i32) -> (i32, i32) {
    %c0_i32 = arith.constant 0 : i32
    %c0_i32_0 = arith.constant 0 : i32
    %c0_i32_1 = arith.constant 0 : i32
    return %c0_i32, %c0_i32_0 : i32, i32
  }
  func.func @transform_6(%arg0: i32) -> (i32, i32) {
    %c0_i32 = arith.constant 0 : i32
    %c0_i32_0 = arith.constant 0 : i32
    %c0_i32_1 = arith.constant 0 : i32
    return %c0_i32, %c0_i32_0 : i32, i32
  }
  func.func @transform_7(%arg0: i32) -> (i32, i32) {
    %c0_i32 = arith.constant 0 : i32
    %c0_i32_0 = arith.constant 0 : i32
    %c0_i32_1 = arith.constant 0 : i32
    return %c0_i32, %c0_i32_0 : i32, i32
  }
  func.func @transform_8(%arg0: i32) -> (i32, i32) {
    %c0_i32 = arith.constant 0 : i32
    %c0_i32_0 = arith.constant 0 : i32
    %c0_i32_1 = arith.constant 0 : i32
    return %c0_i32, %c0_i32_0 : i32, i32
  }
  func.func @transform_9(%arg0: i32) -> (i32, i32) {
    %c0_i32 = arith.constant 0 : i32
    %c0_i32_0 = arith.constant 0 : i32
    return %arg0, %c0_i32 : i32, i32
  }
}

</mosaic_0001>

<bundles_post_ra>
// kernel: tpu_custom_call.1
= control target key start
LH: loop header
LB: loop body
LE: loop exit
PB: predicated region body
PF: predicated region fallthrough
CT: control target
= control target key end

     0   :  { %14 = vsyncpa [#allocation3], 0  ;;  %s1279_s0 = inlined_call_operand.hbm [shape: f32[8,128], index: 0, kind: input, shape index: {}]   ;;  %s1280_s1 = inlined_call_operand.hbm [shape: f32[8,128], index: 1, kind: input, shape index: {}]   ;;  %s1281_s2 = inlined_call_operand.hbm [shape: f32[128,512], index: 2, kind: input, shape index: {}]   ;;  %s1282_s3 = inlined_call_operand.hbm [shape: f32[128,512], index: 3, kind: input, shape index: {}]   ;;  %s1283_s4 = inlined_call_operand.vmem [shape: f32[1,512], index: 4, kind: input, shape index: {}]   ;;  %s1284_s5 = inlined_call_operand.hbm [shape: f32[512,256], index: 5, kind: input, shape index: {}]   ;;  %s1285_s6 = inlined_call_operand.vmem [shape: f32[1,256], index: 6, kind: input, shape index: {}]   ;;  %s1286_s7 = inlined_call_operand.hbm [shape: f32[256,128], index: 7, kind: input, shape index: {}]   ;;  %s1287_s8 = inlined_call_operand.vmem [shape: f32[1,128], index: 8, kind: input, shape index: {}]   ;;  %s1288_s9 = inlined_call_operand.hbm [shape: f32[8,128], index: 9, kind: output, shape index: {}]  }
   0x1   :  { %15 = vsyncpa [#allocation6], 0 }
   0x2   :  { %16 = vsyncpa [#allocation9], 0 }
   0x3   :  { %17 = vsyncpa [#allocation12], 0 }
   0x4   :  { %18 = vsyncpa [#allocation4], 0  ;;  %s1167_s30 = smov [#allocation5]  }
   0x5   :  { %s35_s10 = sshll.u32 %s1167_s30, 4  ;;  %s36_s10 = int_to_ptr.vmem [resolvable:$true] %s35_s10 }
   0x6   :  { %s1025_s11 = scalar_lea.vmem %s36_s10, 128  ;;  %p1030_p1 = scmp.lt.s32.totalorder %s36_s10, %s36_s10 }
   0x7   :  { %p1026_p0 = scmp.ne.s32.totalorder %s36_s10, %s1025_s11  ;;  %p1031_p2 = scmp.lt.s32.totalorder %s1025_s11, %s1025_s11 }
   0x9   :  { %p1032_p3 = por %p1031_p2, %p1030_p1 }
   0xb   :  { %p1033_p4 = pnand %p1032_p3, %p1026_p0 }
   0xd   :  { %1036 = shalt.err (!%p1033_p4)
}
   0xe   :  { %38 = dma.hbm_to_vmem [thread:$0]  %s1280_s1, 128, %s36_s10, [#allocation6]  }
   0xf   :  { %s1168_s14 = smov [#allocation8]   ;;  %s1169_s16 = smov [#allocation2]  }
  0x10   :  { %s56_s15 = sshll.u32 %s1168_s14, 4  ;;  %s25_s17 = sshll.u32 %s1169_s16, 4  ;;  %s57_s15 = int_to_ptr.vmem [resolvable:$true] %s56_s15  ;;  %s26_s17 = int_to_ptr.vmem [resolvable:$true] %s25_s17 }
  0x11   :  { %s1045_s18 = scalar_lea.vmem %s57_s15, 8192  ;;  %p1050_p6 = scmp.lt.s32.totalorder %s57_s15, %s57_s15 }
  0x12   :  { %p1046_p5 = scmp.ne.s32.totalorder %s57_s15, %s1045_s18  ;;  %p1051_p7 = scmp.lt.s32.totalorder %s1045_s18, %s1045_s18 }
  0x14   :  { %p1052_p8 = por %p1051_p7, %p1050_p6 }
  0x16   :  { %p1053_p9 = pnand %p1052_p8, %p1046_p5 }
  0x18   :  { %1056 = shalt.err (!%p1053_p9)
}
  0x19   :  { %s1170_s19 = smov 512   ;;  %s1171_s20 = smov 32  }
  0x1a   :  { %62 = dma.hbm_to_vmem [thread:$0]  %s1282_s3, 8192, %s57_s15, [#allocation9], %s1170_s19, %s1170_s19, %s1171_s20  }
  0x1b   :  { %s1065_s1 = scalar_lea.vmem %s26_s17, 128  ;;  %p1070_p11 = scmp.lt.s32.totalorder %s26_s17, %s26_s17 }
  0x1c   :  { %p1066_p10 = scmp.ne.s32.totalorder %s26_s17, %s1065_s1  ;;  %p1071_p12 = scmp.lt.s32.totalorder %s1065_s1, %s1065_s1 }
  0x1e   :  { %p1072_p13 = por %p1071_p12, %p1070_p11 }
  0x20   :  { %p1073_p0 = pnand %p1072_p13, %p1066_p10 }
  0x22   :  { %1076 = shalt.err (!%p1073_p0)
}
  0x23   :  { %28 = dma.hbm_to_vmem [thread:$0]  %s1279_s0, 128, %s26_s17, [#allocation3]  }
  0x24   :  { %s1172_s25 = smov [#allocation7]   ;;  %s1173_s27 = smov [#allocation10]  }
  0x25   :  { %s44_s26 = sshll.u32 %s1172_s25, 4  ;;  %s70_s28 = sshll.u32 %s1173_s27, 4  ;;  %s45_s26 = int_to_ptr.vmem [resolvable:$true] %s44_s26  ;;  %s71_s28 = int_to_ptr.vmem [resolvable:$true] %s70_s28 }
  0x26   :  { %s1085_s29 = scalar_lea.vmem %s45_s26, 8192  ;;  %p1090_p2 = scmp.lt.s32.totalorder %s45_s26, %s45_s26 }
  0x27   :  { %p1086_p1 = scmp.ne.s32.totalorder %s45_s26, %s1085_s29  ;;  %p1091_p3 = scmp.lt.s32.totalorder %s1085_s29, %s1085_s29 }
  0x29   :  { %p1092_p4 = por %p1091_p3, %p1090_p2 }
  0x2b   :  { %p1093_p5 = pnand %p1092_p4, %p1086_p1 }
  0x2d   :  { %1096 = shalt.err (!%p1093_p5)
}
  0x2e   :  { %50 = dma.hbm_to_vmem [thread:$0]  %s1281_s2, 8192, %s45_s26, [#allocation6], %s1170_s19, %s1170_s19, %s1171_s20  }
  0x2f   :  { %s1105_s10 = scalar_lea.vmem %s71_s28, 16384  ;;  %p1110_p7 = scmp.lt.s32.totalorder %s71_s28, %s71_s28 }
  0x30   :  { %p1106_p6 = scmp.ne.s32.totalorder %s71_s28, %s1105_s10  ;;  %p1111_p8 = scmp.lt.s32.totalorder %s1105_s10, %s1105_s10 }
  0x32   :  { %p1112_p9 = por %p1111_p8, %p1110_p7 }
  0x34   :  { %p1113_p10 = pnand %p1112_p9, %p1106_p6 }
  0x36   :  { %1116 = shalt.err (!%p1113_p10)
}
  0x37   :  { %s1174_s0 = smov 256   ;;  %s1175_s11 = smov 16  }
  0x38   :  { %76 = dma.hbm_to_vmem [thread:$0]  %s1284_s5, 16384, %s71_s28, [#allocation9], %s1174_s0, %s1174_s0, %s1175_s11  }
  0x39   :  { %s1176_s14 = smov [#allocation11]  }
  0x3a   :  { %s84_s15 = sshll.u32 %s1176_s14, 4  ;;  %s85_s15 = int_to_ptr.vmem [resolvable:$true] %s84_s15 }
  0x3b   :  { %s1125_s16 = scalar_lea.vmem %s85_s15, 4096  ;;  %p1130_p12 = scmp.lt.s32.totalorder %s85_s15, %s85_s15 }
  0x3c   :  { %p1126_p11 = scmp.ne.s32.totalorder %s85_s15, %s1125_s16  ;;  %p1131_p13 = scmp.lt.s32.totalorder %s1125_s16, %s1125_s16 }
  0x3e   :  { %p1132_p0 = por %p1131_p13, %p1130_p12 }
  0x40   :  { %p1133_p1 = pnand %p1132_p0, %p1126_p11 }
  0x42   :  { %1136 = shalt.err (!%p1133_p1)
}
  0x43   :  { %s1177_s2 = smov 128   ;;  %s1178_s17 = smov 8  }
  0x44   :  { %90 = dma.hbm_to_vmem [thread:$0]  %s1286_s7, 4096, %s85_s15, [#allocation12], %s1177_s2, %s1177_s2, %s1178_s17  }
  0x45   :  { %1157 = dma.done.wait [#allocation3], 128  }
  0x46   :  { %1158 = vsyncadd [#allocation3], 4294967168 }
  0x47   :  { %1159 = dma.done.wait [#allocation6], 8320  }
  0x48   :  { %1160 = vsyncadd [#allocation6], 4294958976 }
  0x49   :  { %1161 = dma.done.wait [#allocation9], 24576  }
  0x4a   :  { %1162 = vsyncadd [#allocation9], 4294942720 }
  0x4b   :  { %1163 = dma.done.wait [#allocation12], 4096  }
  0x4c   :  { %1164 = vsyncadd [#allocation12], 4294963200  ;;  %v1179_v0 = vmov 0.0   ;;  %v238_v1 = vld [vmem:[#allocation8 + $0x1e8] sm:$0xff]  ;;  %v240_v2 = vld [vmem:[#allocation8 + $0x1f8] sm:$0xff]  ;;  %s1180_s22 = smov [#allocation13]  }
  0x4d   :  { %305 = vmatprep.mubr.f32.mxu0 %v1179_v0  ;;  %376 = vmatprep.mubr.f32.mxu1 %v1179_v0  ;;  %v237_v3 = vld [vmem:[#allocation8 + $0x1e0] sm:$0xff]  ;;  %v239_v4 = vld [vmem:[#allocation8 + $0x1f0] sm:$0xff]  ;;  %v234_v5 = vld [vmem:[#allocation8 + $0x1c8] sm:$0xff]  ;;  %s955_s1 = sshll.u32 %s1180_s22, 4  ;;  %s956_s1 = int_to_ptr.vmem [resolvable:$true] %s955_s1 }
  0x4e   :  { %241 = vmatprep.subr.mxu0 %v238_v1  ;;  %312 = vmatprep.subr.mxu1 %v240_v2  ;;  %v236_v6 = vld [vmem:[#allocation8 + $0x1d8] sm:$0xff]  ;;  %v233_v7 = vld [vmem:[#allocation8 + $0x1c0] sm:$0xff]  ;;  %v235_v8 = vld [vmem:[#allocation8 + $0x1d0] sm:$0xff]  ;;  %s1137_s23 = scalar_lea.vmem %s956_s1, 128  ;;  %p1142_p3 = scmp.lt.s32.totalorder %s956_s1, %s956_s1 }
  0x4f   :  { %242 = vmatpush1.msra.mxu0 %v237_v3  ;;  %313 = vmatpush1.msra.mxu1 %v239_v4  ;;  %v230_v9 = vld [vmem:[#allocation8 + $0x1a8] sm:$0xff]  ;;  %v232_v10 = vld [vmem:[#allocation8 + $0x1b8] sm:$0xff]  ;;  %v229_v11 = vld [vmem:[#allocation8 + $0x1a0] sm:$0xff]  ;;  %p1138_p2 = scmp.ne.s32.totalorder %s956_s1, %s1137_s23  ;;  %p1143_p4 = scmp.lt.s32.totalorder %s1137_s23, %s1137_s23 }
  0x50   :  { %243 = vmatprep.subr.mxu0 %v234_v5  ;;  %314 = vmatprep.subr.mxu1 %v236_v6  ;;  %v231_v12 = vld [vmem:[#allocation8 + $0x1b0] sm:$0xff]  ;;  %v226_v13 = vld [vmem:[#allocation8 + $0x188] sm:$0xff]  ;;  %v228_v14 = vld [vmem:[#allocation8 + $0x198] sm:$0xff] }
  0x51   :  { %244 = vmatpush1.msra.mxu0 %v233_v7  ;;  %315 = vmatpush1.msra.mxu1 %v235_v8  ;;  %v225_v15 = vld [vmem:[#allocation8 + $0x180] sm:$0xff]  ;;  %v227_v16 = vld [vmem:[#allocation8 + $0x190] sm:$0xff]  ;;  %v222_v17 = vld [vmem:[#allocation8 + $0x168] sm:$0xff]  ;;  %p1144_p5 = por %p1143_p4, %p1142_p3 }
  0x52   :  { %245 = vmatprep.subr.mxu0 %v230_v9  ;;  %316 = vmatprep.subr.mxu1 %v232_v10  ;;  %v224_v18 = vld [vmem:[#allocation8 + $0x178] sm:$0xff]  ;;  %v221_v19 = vld [vmem:[#allocation8 + $0x160] sm:$0xff]  ;;  %v223_v20 = vld [vmem:[#allocation8 + $0x170] sm:$0xff] }
  0x53   :  { %246 = vmatpush1.msra.mxu0 %v229_v11  ;;  %317 = vmatpush1.msra.mxu1 %v231_v12  ;;  %v218_v21 = vld [vmem:[#allocation8 + $0x148] sm:$0xff]  ;;  %v220_v22 = vld [vmem:[#allocation8 + $0x158] sm:$0xff]  ;;  %v217_v23 = vld [vmem:[#allocation8 + $0x140] sm:$0xff]  ;;  %p1145_p6 = pnand %p1144_p5, %p1138_p2 }
  0x54   :  { %247 = vmatprep.subr.mxu0 %v226_v13  ;;  %318 = vmatprep.subr.mxu1 %v228_v14  ;;  %v219_v24 = vld [vmem:[#allocation8 + $0x150] sm:$0xff]  ;;  %v214_v25 = vld [vmem:[#allocation8 + $0x128] sm:$0xff]  ;;  %v216_v26 = vld [vmem:[#allocation8 + $0x138] sm:$0xff] }
  0x55   :  { %248 = vmatpush1.msra.mxu0 %v225_v15  ;;  %319 = vmatpush1.msra.mxu1 %v227_v16  ;;  %v213_v27 = vld [vmem:[#allocation8 + $0x120] sm:$0xff]  ;;  %v215_v28 = vld [vmem:[#allocation8 + $0x130] sm:$0xff]  ;;  %v210_v29 = vld [vmem:[#allocation8 + $0x108] sm:$0xff] }
  0x56   :  { %249 = vmatprep.subr.mxu0 %v222_v17  ;;  %320 = vmatprep.subr.mxu1 %v224_v18  ;;  %v212_v30 = vld [vmem:[#allocation8 + $0x118] sm:$0xff]  ;;  %v209_v31 = vld [vmem:[#allocation8 + $0x100] sm:$0xff]  ;;  %v211_v32 = vld [vmem:[#allocation8 + $0x110] sm:$0xff] }
  0x57   :  { %250 = vmatpush1.msra.mxu0 %v221_v19  ;;  %321 = vmatpush1.msra.mxu1 %v223_v20  ;;  %v206_v33 = vld [vmem:[#allocation8 + $0xe8] sm:$0xff]  ;;  %v208_v34 = vld [vmem:[#allocation8 + $0xf8] sm:$0xff]  ;;  %v205_v35 = vld [vmem:[#allocation8 + $0xe0] sm:$0xff] }
  0x58   :  { %251 = vmatprep.subr.mxu0 %v218_v21  ;;  %322 = vmatprep.subr.mxu1 %v220_v22  ;;  %v207_v36 = vld [vmem:[#allocation8 + $0xf0] sm:$0xff]  ;;  %v202_v37 = vld [vmem:[#allocation8 + $0xc8] sm:$0xff]  ;;  %v204_v38 = vld [vmem:[#allocation8 + $0xd8] sm:$0xff] }
  0x59   :  { %252 = vmatpush1.msra.mxu0 %v217_v23  ;;  %323 = vmatpush1.msra.mxu1 %v219_v24  ;;  %v201_v39 = vld [vmem:[#allocation8 + $0xc0] sm:$0xff]  ;;  %v203_v40 = vld [vmem:[#allocation8 + $0xd0] sm:$0xff]  ;;  %v198_v41 = vld [vmem:[#allocation8 + $0xa8] sm:$0xff] }
  0x5a   :  { %253 = vmatprep.subr.mxu0 %v214_v25  ;;  %324 = vmatprep.subr.mxu1 %v216_v26  ;;  %v200_v42 = vld [vmem:[#allocation8 + $0xb8] sm:$0xff]  ;;  %v197_v43 = vld [vmem:[#allocation8 + $0xa0] sm:$0xff]  ;;  %v199_v44 = vld [vmem:[#allocation8 + $0xb0] sm:$0xff] }
  0x5b   :  { %254 = vmatpush1.msra.mxu0 %v213_v27  ;;  %325 = vmatpush1.msra.mxu1 %v215_v28  ;;  %v194_v45 = vld [vmem:[#allocation8 + $0x88] sm:$0xff]  ;;  %v196_v46 = vld [vmem:[#allocation8 + $0x98] sm:$0xff]  ;;  %v193_v47 = vld [vmem:[#allocation8 + $0x80] sm:$0xff] }
  0x5c   :  { %255 = vmatprep.subr.mxu0 %v210_v29  ;;  %326 = vmatprep.subr.mxu1 %v212_v30  ;;  %v195_v48 = vld [vmem:[#allocation8 + $0x90] sm:$0xff]  ;;  %v190_v49 = vld [vmem:[#allocation8 + $0x68] sm:$0xff]  ;;  %v192_v50 = vld [vmem:[#allocation8 + $0x78] sm:$0xff] }
  0x5d   :  { %256 = vmatpush1.msra.mxu0 %v209_v31  ;;  %327 = vmatpush1.msra.mxu1 %v211_v32  ;;  %v189_v51 = vld [vmem:[#allocation8 + $0x60] sm:$0xff]  ;;  %v191_v52 = vld [vmem:[#allocation8 + $0x70] sm:$0xff]  ;;  %v186_v53 = vld [vmem:[#allocation8 + $0x48] sm:$0xff] }
  0x5e   :  { %257 = vmatprep.subr.mxu0 %v206_v33  ;;  %328 = vmatprep.subr.mxu1 %v208_v34  ;;  %v188_v54 = vld [vmem:[#allocation8 + $0x58] sm:$0xff]  ;;  %v185_v55 = vld [vmem:[#allocation8 + $0x40] sm:$0xff]  ;;  %v187_v56 = vld [vmem:[#allocation8 + $0x50] sm:$0xff] }
  0x5f   :  { %258 = vmatpush1.msra.mxu0 %v205_v35  ;;  %329 = vmatpush1.msra.mxu1 %v207_v36  ;;  %v182_v57 = vld [vmem:[#allocation8 + $0x28] sm:$0xff]  ;;  %v184_v58 = vld [vmem:[#allocation8 + $0x38] sm:$0xff]  ;;  %v181_v59 = vld [vmem:[#allocation8 + $0x20] sm:$0xff] }
  0x60   :  { %259 = vmatprep.subr.mxu0 %v202_v37  ;;  %330 = vmatprep.subr.mxu1 %v204_v38  ;;  %v183_v60 = vld [vmem:[#allocation8 + $0x30] sm:$0xff]  ;;  %v178_v61 = vld [vmem:[#allocation8 + $0x8] sm:$0xff]  ;;  %v180_v62 = vld [vmem:[#allocation8 + $0x18] sm:$0xff] }
  0x61   :  { %260 = vmatpush1.msra.mxu0 %v201_v39  ;;  %331 = vmatpush1.msra.mxu1 %v203_v40  ;;  %v177_v63 = vld [vmem:[#allocation8] sm:$0xff]  ;;  %v179_v1 = vld [vmem:[#allocation8 + $0x10] sm:$0xff]  ;;  %v176_v2 = vld [vmem:[#allocation5] sm:$0xff] }
  0x62   :  { %261 = vmatprep.subr.mxu0 %v198_v41  ;;  %332 = vmatprep.subr.mxu1 %v200_v42  ;;  %v173_v3 = vld [vmem:[#allocation7 + $0x1e8] sm:$0xff]  ;;  %v175_v4 = vld [vmem:[#allocation7 + $0x1f8] sm:$0xff]  ;;  %v172_v5 = vld [vmem:[#allocation7 + $0x1e0] sm:$0xff] }
  0x63   :  { %262 = vmatpush1.msra.mxu0 %v197_v43  ;;  %333 = vmatpush1.msra.mxu1 %v199_v44  ;;  %v174_v6 = vld [vmem:[#allocation7 + $0x1f0] sm:$0xff]  ;;  %v169_v7 = vld [vmem:[#allocation7 + $0x1c8] sm:$0xff]  ;;  %v171_v8 = vld [vmem:[#allocation7 + $0x1d8] sm:$0xff] }
  0x64   :  { %263 = vmatprep.subr.mxu0 %v194_v45  ;;  %334 = vmatprep.subr.mxu1 %v196_v46  ;;  %v168_v9 = vld [vmem:[#allocation7 + $0x1c0] sm:$0xff]  ;;  %v170_v10 = vld [vmem:[#allocation7 + $0x1d0] sm:$0xff]  ;;  %v165_v11 = vld [vmem:[#allocation7 + $0x1a8] sm:$0xff] }
  0x65   :  { %264 = vmatpush1.msra.mxu0 %v193_v47  ;;  %335 = vmatpush1.msra.mxu1 %v195_v48  ;;  %v167_v12 = vld [vmem:[#allocation7 + $0x1b8] sm:$0xff]  ;;  %v164_v13 = vld [vmem:[#allocation7 + $0x1a0] sm:$0xff]  ;;  %v166_v14 = vld [vmem:[#allocation7 + $0x1b0] sm:$0xff] }
  0x66   :  { %265 = vmatprep.subr.mxu0 %v190_v49  ;;  %336 = vmatprep.subr.mxu1 %v192_v50  ;;  %v161_v15 = vld [vmem:[#allocation7 + $0x188] sm:$0xff]  ;;  %v163_v16 = vld [vmem:[#allocation7 + $0x198] sm:$0xff]  ;;  %v160_v17 = vld [vmem:[#allocation7 + $0x180] sm:$0xff] }
  0x67   :  { %266 = vmatpush1.msra.mxu0 %v189_v51  ;;  %337 = vmatpush1.msra.mxu1 %v191_v52  ;;  %v162_v18 = vld [vmem:[#allocation7 + $0x190] sm:$0xff]  ;;  %v157_v19 = vld [vmem:[#allocation7 + $0x168] sm:$0xff]  ;;  %v159_v20 = vld [vmem:[#allocation7 + $0x178] sm:$0xff] }
  0x68   :  { %267 = vmatprep.subr.mxu0 %v186_v53  ;;  %338 = vmatprep.subr.mxu1 %v188_v54  ;;  %v156_v21 = vld [vmem:[#allocation7 + $0x160] sm:$0xff]  ;;  %v158_v22 = vld [vmem:[#allocation7 + $0x170] sm:$0xff]  ;;  %v153_v23 = vld [vmem:[#allocation7 + $0x148] sm:$0xff] }
  0x69   :  { %268 = vmatpush1.msra.mxu0 %v185_v55  ;;  %339 = vmatpush1.msra.mxu1 %v187_v56  ;;  %v155_v24 = vld [vmem:[#allocation7 + $0x158] sm:$0xff]  ;;  %v152_v25 = vld [vmem:[#allocation7 + $0x140] sm:$0xff]  ;;  %v154_v26 = vld [vmem:[#allocation7 + $0x150] sm:$0xff] }
  0x6a   :  { %269 = vmatprep.subr.mxu0 %v182_v57  ;;  %340 = vmatprep.subr.mxu1 %v184_v58  ;;  %v149_v27 = vld [vmem:[#allocation7 + $0x128] sm:$0xff]  ;;  %v151_v28 = vld [vmem:[#allocation7 + $0x138] sm:$0xff]  ;;  %v148_v29 = vld [vmem:[#allocation7 + $0x120] sm:$0xff] }
  0x6b   :  { %270 = vmatpush1.msra.mxu0 %v181_v59  ;;  %341 = vmatpush1.msra.mxu1 %v183_v60  ;;  %v150_v30 = vld [vmem:[#allocation7 + $0x130] sm:$0xff]  ;;  %v145_v31 = vld [vmem:[#allocation7 + $0x108] sm:$0xff]  ;;  %v147_v32 = vld [vmem:[#allocation7 + $0x118] sm:$0xff] }
  0x6c   :  { %271 = vmatprep.subr.mxu0 %v178_v61  ;;  %342 = vmatprep.subr.mxu1 %v180_v62  ;;  %v144_v33 = vld [vmem:[#allocation7 + $0x100] sm:$0xff]  ;;  %v146_v34 = vld [vmem:[#allocation7 + $0x110] sm:$0xff]  ;;  %v141_v35 = vld [vmem:[#allocation7 + $0xe8] sm:$0xff] }
  0x6d   :  { %272 = vmatpush1.msra.mxu0 %v177_v63  ;;  %343 = vmatpush1.msra.mxu1 %v179_v1  ;;  %v143_v36 = vld [vmem:[#allocation7 + $0xf8] sm:$0xff]  ;;  %v140_v37 = vld [vmem:[#allocation7 + $0xe0] sm:$0xff]  ;;  %v142_v38 = vld [vmem:[#allocation7 + $0xf0] sm:$0xff] }
  0x6e   :  { %306 = vmatmul.mubr.f32.vlgmr.msra.gmra.mxu0 %v176_v2  ;;  %383 = vmatprep.subr.mxu0 %v173_v3  ;;  %v137_v39 = vld [vmem:[#allocation7 + $0xc8] sm:$0xff]  ;;  %v139_v40 = vld [vmem:[#allocation7 + $0xd8] sm:$0xff]  ;;  %v136_v41 = vld [vmem:[#allocation7 + $0xc0] sm:$0xff] }
  0x6f   :  { %454 = vmatprep.subr.mxu1 %v175_v4  ;;  %377 = vmatmul.mubr.f32.vlgmr.msra.gmra.mxu1 %v176_v2  ;;  %v138_v42 = vld [vmem:[#allocation7 + $0xd0] sm:$0xff]  ;;  %v133_v43 = vld [vmem:[#allocation7 + $0xa8] sm:$0xff]  ;;  %v135_v44 = vld [vmem:[#allocation7 + $0xb8] sm:$0xff] }
  0x70   :  { %384 = vmatpush1.msra.mxu0 %v172_v5  ;;  %455 = vmatpush1.msra.mxu1 %v174_v6  ;;  %v132_v45 = vld [vmem:[#allocation7 + $0xa0] sm:$0xff]  ;;  %v134_v46 = vld [vmem:[#allocation7 + $0xb0] sm:$0xff]  ;;  %v129_v47 = vld [vmem:[#allocation7 + $0x88] sm:$0xff] }
  0x71   :  { %385 = vmatprep.subr.mxu0 %v169_v7  ;;  %456 = vmatprep.subr.mxu1 %v171_v8  ;;  %v131_v48 = vld [vmem:[#allocation7 + $0x98] sm:$0xff]  ;;  %v128_v49 = vld [vmem:[#allocation7 + $0x80] sm:$0xff]  ;;  %v130_v50 = vld [vmem:[#allocation7 + $0x90] sm:$0xff] }
  0x72   :  { %386 = vmatpush1.msra.mxu0 %v168_v9  ;;  %457 = vmatpush1.msra.mxu1 %v170_v10  ;;  %v125_v51 = vld [vmem:[#allocation7 + $0x68] sm:$0xff]  ;;  %v127_v52 = vld [vmem:[#allocation7 + $0x78] sm:$0xff]  ;;  %v124_v53 = vld [vmem:[#allocation7 + $0x60] sm:$0xff] }
  0x73   :  { %387 = vmatprep.subr.mxu0 %v165_v11  ;;  %458 = vmatprep.subr.mxu1 %v167_v12  ;;  %v126_v54 = vld [vmem:[#allocation7 + $0x70] sm:$0xff]  ;;  %v121_v55 = vld [vmem:[#allocation7 + $0x48] sm:$0xff]  ;;  %v123_v56 = vld [vmem:[#allocation7 + $0x58] sm:$0xff] }
  0x74   :  { %388 = vmatpush1.msra.mxu0 %v164_v13  ;;  %459 = vmatpush1.msra.mxu1 %v166_v14  ;;  %v120_v57 = vld [vmem:[#allocation7 + $0x40] sm:$0xff]  ;;  %v122_v58 = vld [vmem:[#allocation7 + $0x50] sm:$0xff]  ;;  %v117_v59 = vld [vmem:[#allocation7 + $0x28] sm:$0xff] }
  0x75   :  { %389 = vmatprep.subr.mxu0 %v161_v15  ;;  %460 = vmatprep.subr.mxu1 %v163_v16  ;;  %v119_v60 = vld [vmem:[#allocation7 + $0x38] sm:$0xff]  ;;  %v116_v61 = vld [vmem:[#allocation7 + $0x20] sm:$0xff]  ;;  %v118_v62 = vld [vmem:[#allocation7 + $0x30] sm:$0xff] }
  0x76   :  { %390 = vmatpush1.msra.mxu0 %v160_v17  ;;  %461 = vmatpush1.msra.mxu1 %v162_v18  ;;  %v113_v63 = vld [vmem:[#allocation7 + $0x8] sm:$0xff]  ;;  %v115_v1 = vld [vmem:[#allocation7 + $0x18] sm:$0xff]  ;;  %v112_v2 = vld [vmem:[#allocation7] sm:$0xff] }
  0x77   :  { %391 = vmatprep.subr.mxu0 %v157_v19  ;;  %462 = vmatprep.subr.mxu1 %v159_v20  ;;  %v114_v3 = vld [vmem:[#allocation7 + $0x10] sm:$0xff]  ;;  %v586_v5 = vld [vmem:[#allocation10 + $0xf8] sm:$0xff]  ;;  %v584_v9 = vld [vmem:[#allocation10 + $0xe8] sm:$0xff] }
  0x78   :  { %392 = vmatpush1.msra.mxu0 %v156_v21  ;;  %463 = vmatpush1.msra.mxu1 %v158_v22  ;;  %v111_v4 = vld [vmem:[#allocation2] sm:$0xff]  ;;  %v650_v6 = vld [vmem:[#allocation10 + $0x2f8] sm:$0xff]  ;;  %v648_v10 = vld [vmem:[#allocation10 + $0x2e8] sm:$0xff] }
  0x79   :  { %393 = vmatprep.subr.mxu0 %v153_v23  ;;  %464 = vmatprep.subr.mxu1 %v155_v24  ;;  %v585_v7 = vld [vmem:[#allocation10 + $0xf0] sm:$0xff]  ;;  %v583_v11 = vld [vmem:[#allocation10 + $0xe0] sm:$0xff]  ;;  %v582_v13 = vld [vmem:[#allocation10 + $0xd8] sm:$0xff] }
  0x7a   :  { %394 = vmatpush1.msra.mxu0 %v152_v25  ;;  %465 = vmatpush1.msra.mxu1 %v154_v26  ;;  %v649_v8 = vld [vmem:[#allocation10 + $0x2f0] sm:$0xff]  ;;  %v647_v12 = vld [vmem:[#allocation10 + $0x2e0] sm:$0xff]  ;;  %v646_v14 = vld [vmem:[#allocation10 + $0x2d8] sm:$0xff] }
  0x7b   :  { %395 = vmatprep.subr.mxu0 %v149_v27  ;;  %466 = vmatprep.subr.mxu1 %v151_v28  ;;  %v581_v15 = vld [vmem:[#allocation10 + $0xd0] sm:$0xff]  ;;  %v644_v17 = vld [vmem:[#allocation10 + $0x2c8] sm:$0xff]  ;;  %v579_v18 = vld [vmem:[#allocation10 + $0xc0] sm:$0xff] }
  0x7c   :  { %396 = vmatpush1.msra.mxu0 %v148_v29  ;;  %467 = vmatpush1.msra.mxu1 %v150_v30  ;;  %v645_v16 = vld [vmem:[#allocation10 + $0x2d0] sm:$0xff]  ;;  %v643_v19 = vld [vmem:[#allocation10 + $0x2c0] sm:$0xff]  ;;  %v578_v20 = vld [vmem:[#allocation10 + $0xb8] sm:$0xff] }
  0x7d   :  { %397 = vmatprep.subr.mxu0 %v145_v31  ;;  %468 = vmatprep.subr.mxu1 %v147_v32  ;;  %v642_v21 = vld [vmem:[#allocation10 + $0x2b8] sm:$0xff]  ;;  %v577_v22 = vld [vmem:[#allocation10 + $0xb0] sm:$0xff]  ;;  %v576_v24 = vld [vmem:[#allocation10 + $0xa8] sm:$0xff] }
  0x7e   :  { %398 = vmatpush1.msra.mxu0 %v144_v33  ;;  %469 = vmatpush1.msra.mxu1 %v146_v34  ;;  %v641_v23 = vld [vmem:[#allocation10 + $0x2b0] sm:$0xff]  ;;  %v640_v25 = vld [vmem:[#allocation10 + $0x2a8] sm:$0xff]  ;;  %v575_v26 = vld [vmem:[#allocation10 + $0xa0] sm:$0xff] }
  0x7f   :  { %399 = vmatprep.subr.mxu0 %v141_v35  ;;  %470 = vmatprep.subr.mxu1 %v143_v36  ;;  %v639_v27 = vld [vmem:[#allocation10 + $0x2a0] sm:$0xff]  ;;  %v574_v28 = vld [vmem:[#allocation10 + $0x98] sm:$0xff]  ;;  %v573_v30 = vld [vmem:[#allocation10 + $0x90] sm:$0xff] }
  0x80   :  { %400 = vmatpush1.msra.mxu0 %v140_v37  ;;  %471 = vmatpush1.msra.mxu1 %v142_v38  ;;  %v638_v29 = vld [vmem:[#allocation10 + $0x298] sm:$0xff]  ;;  %v637_v31 = vld [vmem:[#allocation10 + $0x290] sm:$0xff]  ;;  %v572_v32 = vld [vmem:[#allocation10 + $0x88] sm:$0xff] }
  0x81   :  { %401 = vmatprep.subr.mxu0 %v137_v39  ;;  %472 = vmatprep.subr.mxu1 %v139_v40  ;;  %v636_v33 = vld [vmem:[#allocation10 + $0x288] sm:$0xff]  ;;  %v571_v34 = vld [vmem:[#allocation10 + $0x80] sm:$0xff]  ;;  %v570_v36 = vld [vmem:[#allocation10 + $0x78] sm:$0xff] }
  0x82   :  { %402 = vmatpush1.msra.mxu0 %v136_v41  ;;  %473 = vmatpush1.msra.mxu1 %v138_v42  ;;  %v635_v35 = vld [vmem:[#allocation10 + $0x280] sm:$0xff]  ;;  %v634_v37 = vld [vmem:[#allocation10 + $0x278] sm:$0xff]  ;;  %v569_v38 = vld [vmem:[#allocation10 + $0x70] sm:$0xff] }
  0x83   :  { %403 = vmatprep.subr.mxu0 %v133_v43  ;;  %474 = vmatprep.subr.mxu1 %v135_v44  ;;  %v633_v39 = vld [vmem:[#allocation10 + $0x270] sm:$0xff]  ;;  %v568_v40 = vld [vmem:[#allocation10 + $0x68] sm:$0xff]  ;;  %v567_v42 = vld [vmem:[#allocation10 + $0x60] sm:$0xff] }
  0x84   :  { %404 = vmatpush1.msra.mxu0 %v132_v45  ;;  %475 = vmatpush1.msra.mxu1 %v134_v46  ;;  %v632_v41 = vld [vmem:[#allocation10 + $0x268] sm:$0xff]  ;;  %v631_v43 = vld [vmem:[#allocation10 + $0x260] sm:$0xff]  ;;  %v566_v44 = vld [vmem:[#allocation10 + $0x58] sm:$0xff] }
  0x85   :  { %405 = vmatprep.subr.mxu0 %v129_v47  ;;  %476 = vmatprep.subr.mxu1 %v131_v48  ;;  %v630_v45 = vld [vmem:[#allocation10 + $0x258] sm:$0xff]  ;;  %v565_v46 = vld [vmem:[#allocation10 + $0x50] sm:$0xff]  ;;  %v564_v48 = vld [vmem:[#allocation10 + $0x48] sm:$0xff] }
  0x86   :  { %406 = vmatpush1.msra.mxu0 %v128_v49  ;;  %477 = vmatpush1.msra.mxu1 %v130_v50  ;;  %v629_v47 = vld [vmem:[#allocation10 + $0x250] sm:$0xff]  ;;  %v628_v49 = vld [vmem:[#allocation10 + $0x248] sm:$0xff]  ;;  %v563_v50 = vld [vmem:[#allocation10 + $0x40] sm:$0xff] }
  0x87   :  { %407 = vmatprep.subr.mxu0 %v125_v51  ;;  %478 = vmatprep.subr.mxu1 %v127_v52  ;;  %v627_v51 = vld [vmem:[#allocation10 + $0x240] sm:$0xff]  ;;  %v562_v52 = vld [vmem:[#allocation10 + $0x38] sm:$0xff] }
  0x88   :  { %408 = vmatpush1.msra.mxu0 %v124_v53  ;;  %479 = vmatpush1.msra.mxu1 %v126_v54  ;;  %v626_v53 = vld [vmem:[#allocation10 + $0x238] sm:$0xff]  ;;  %v561_v54 = vld [vmem:[#allocation10 + $0x30] sm:$0xff] }
  0x89   :  { %409 = vmatprep.subr.mxu0 %v121_v55  ;;  %480 = vmatprep.subr.mxu1 %v123_v56  ;;  %v625_v55 = vld [vmem:[#allocation10 + $0x230] sm:$0xff]  ;;  %v560_v56 = vld [vmem:[#allocation10 + $0x28] sm:$0xff] }
  0x8a   :  { %410 = vmatpush1.msra.mxu0 %v120_v57  ;;  %481 = vmatpush1.msra.mxu1 %v122_v58  ;;  %v624_v57 = vld [vmem:[#allocation10 + $0x228] sm:$0xff]  ;;  %v559_v58 = vld [vmem:[#allocation10 + $0x20] sm:$0xff] }
  0x8b   :  { %411 = vmatprep.subr.mxu0 %v117_v59  ;;  %482 = vmatprep.subr.mxu1 %v119_v60  ;;  %v623_v59 = vld [vmem:[#allocation10 + $0x220] sm:$0xff]  ;;  %v558_v60 = vld [vmem:[#allocation10 + $0x18] sm:$0xff] }
  0x8c   :  { %412 = vmatpush1.msra.mxu0 %v116_v61  ;;  %483 = vmatpush1.msra.mxu1 %v118_v62  ;;  %v622_v61 = vld [vmem:[#allocation10 + $0x218] sm:$0xff]  ;;  %v557_v62 = vld [vmem:[#allocation10 + $0x10] sm:$0xff] }
  0x8d   :  { %413 = vmatprep.subr.mxu0 %v113_v63  ;;  %484 = vmatprep.subr.mxu1 %v115_v1  ;;  %v621_v63 = vld [vmem:[#allocation10 + $0x210] sm:$0xff]  ;;  %v556_v1 = vld [vmem:[#allocation10 + $0x8] sm:$0xff] }
  0x8e   :  { %414 = vmatpush1.msra.mxu0 %v112_v2  ;;  %447 = vmatprep.mubr.f32.mxu0 %v1179_v0  ;;  %v620_v2 = vld [vmem:[#allocation10 + $0x208] sm:$0xff] }
  0x8f   :  { %485 = vmatpush1.msra.mxu1 %v114_v3  ;;  %518 = vmatprep.mubr.f32.mxu1 %v1179_v0  ;;  %v580_v0 = vld [vmem:[#allocation10 + $0xc8] sm:$0xff]  ;;  %v555_v3 = vld [vmem:[#allocation10] sm:$0xff] }
  0x90   :  { %448 = vmatmul.mubr.f32.vlgmr.msra.gmra.mxu0 %v111_v4  ;;  %519 = vmatmul.mubr.f32.vlgmr.msra.gmra.mxu1 %v111_v4  ;;  %v619_v4 = vld [vmem:[#allocation10 + $0x200] sm:$0xff] }
  0x91   :  { %695 = vmatprep.subr.mxu0 %v586_v5  ;;  %766 = vmatprep.subr.mxu1 %v650_v6  ;;  %v618_v5 = vld [vmem:[#allocation10 + $0x1f8] sm:$0xff] }
  0x92   :  { %696 = vmatpush1.msra.mxu0 %v585_v7  ;;  %767 = vmatpush1.msra.mxu1 %v649_v8  ;;  %v682_v6 = vld [vmem:[#allocation10 + $0x3f8] sm:$0xff]  ;;  %v617_v7 = vld [vmem:[#allocation10 + $0x1f0] sm:$0xff] }
  0x93   :  { %697 = vmatprep.subr.mxu0 %v584_v9  ;;  %768 = vmatprep.subr.mxu1 %v648_v10  ;;  %v681_v8 = vld [vmem:[#allocation10 + $0x3f0] sm:$0xff]  ;;  %v616_v9 = vld [vmem:[#allocation10 + $0x1e8] sm:$0xff] }
  0x94   :  { %698 = vmatpush1.msra.mxu0 %v583_v11  ;;  %769 = vmatpush1.msra.mxu1 %v647_v12  ;;  %v680_v10 = vld [vmem:[#allocation10 + $0x3e8] sm:$0xff]  ;;  %v615_v11 = vld [vmem:[#allocation10 + $0x1e0] sm:$0xff] }
  0x95   :  { %699 = vmatprep.subr.mxu0 %v582_v13  ;;  %770 = vmatprep.subr.mxu1 %v646_v14  ;;  %v679_v12 = vld [vmem:[#allocation10 + $0x3e0] sm:$0xff]  ;;  %v614_v13 = vld [vmem:[#allocation10 + $0x1d8] sm:$0xff] }
  0x96   :  { %700 = vmatpush1.msra.mxu0 %v581_v15  ;;  %771 = vmatpush1.msra.mxu1 %v645_v16  ;;  %v678_v14 = vld [vmem:[#allocation10 + $0x3d8] sm:$0xff]  ;;  %v613_v15 = vld [vmem:[#allocation10 + $0x1d0] sm:$0xff] }
  0x97   :  { %701 = vmatprep.subr.mxu0 %v580_v0  ;;  %772 = vmatprep.subr.mxu1 %v644_v17  ;;  %v677_v16 = vld [vmem:[#allocation10 + $0x3d0] sm:$0xff]  ;;  %v612_v0 = vld [vmem:[#allocation10 + $0x1c8] sm:$0xff] }
  0x98   :  { %702 = vmatpush1.msra.mxu0 %v579_v18  ;;  %773 = vmatpush1.msra.mxu1 %v643_v19  ;;  %v676_v17 = vld [vmem:[#allocation10 + $0x3c8] sm:$0xff]  ;;  %v611_v18 = vld [vmem:[#allocation10 + $0x1c0] sm:$0xff] }
  0x99   :  { %703 = vmatprep.subr.mxu0 %v578_v20  ;;  %774 = vmatprep.subr.mxu1 %v642_v21  ;;  %v675_v19 = vld [vmem:[#allocation10 + $0x3c0] sm:$0xff]  ;;  %v610_v20 = vld [vmem:[#allocation10 + $0x1b8] sm:$0xff] }
  0x9a   :  { %704 = vmatpush1.msra.mxu0 %v577_v22  ;;  %775 = vmatpush1.msra.mxu1 %v641_v23  ;;  %v674_v21 = vld [vmem:[#allocation10 + $0x3b8] sm:$0xff]  ;;  %v609_v22 = vld [vmem:[#allocation10 + $0x1b0] sm:$0xff] }
  0x9b   :  { %705 = vmatprep.subr.mxu0 %v576_v24  ;;  %776 = vmatprep.subr.mxu1 %v640_v25  ;;  %v673_v23 = vld [vmem:[#allocation10 + $0x3b0] sm:$0xff]  ;;  %v608_v24 = vld [vmem:[#allocation10 + $0x1a8] sm:$0xff] }
  0x9c   :  { %706 = vmatpush1.msra.mxu0 %v575_v26  ;;  %777 = vmatpush1.msra.mxu1 %v639_v27  ;;  %v672_v25 = vld [vmem:[#allocation10 + $0x3a8] sm:$0xff]  ;;  %v607_v26 = vld [vmem:[#allocation10 + $0x1a0] sm:$0xff] }
  0x9d   :  { %707 = vmatprep.subr.mxu0 %v574_v28  ;;  %778 = vmatprep.subr.mxu1 %v638_v29  ;;  %v671_v27 = vld [vmem:[#allocation10 + $0x3a0] sm:$0xff]  ;;  %v606_v28 = vld [vmem:[#allocation10 + $0x198] sm:$0xff] }
  0x9e   :  { %708 = vmatpush1.msra.mxu0 %v573_v30  ;;  %779 = vmatpush1.msra.mxu1 %v637_v31  ;;  %v670_v29 = vld [vmem:[#allocation10 + $0x398] sm:$0xff]  ;;  %v605_v30 = vld [vmem:[#allocation10 + $0x190] sm:$0xff] }
  0x9f   :  { %709 = vmatprep.subr.mxu0 %v572_v32  ;;  %780 = vmatprep.subr.mxu1 %v636_v33  ;;  %v669_v31 = vld [vmem:[#allocation10 + $0x390] sm:$0xff]  ;;  %v604_v32 = vld [vmem:[#allocation10 + $0x188] sm:$0xff] }
  0xa0   :  { %710 = vmatpush1.msra.mxu0 %v571_v34  ;;  %781 = vmatpush1.msra.mxu1 %v635_v35  ;;  %v668_v33 = vld [vmem:[#allocation10 + $0x388] sm:$0xff]  ;;  %v603_v34 = vld [vmem:[#allocation10 + $0x180] sm:$0xff] }
  0xa1   :  { %711 = vmatprep.subr.mxu0 %v570_v36  ;;  %782 = vmatprep.subr.mxu1 %v634_v37  ;;  %v667_v35 = vld [vmem:[#allocation10 + $0x380] sm:$0xff]  ;;  %v602_v36 = vld [vmem:[#allocation10 + $0x178] sm:$0xff] }
  0xa2   :  { %712 = vmatpush1.msra.mxu0 %v569_v38  ;;  %783 = vmatpush1.msra.mxu1 %v633_v39  ;;  %v666_v37 = vld [vmem:[#allocation10 + $0x378] sm:$0xff]  ;;  %v601_v38 = vld [vmem:[#allocation10 + $0x170] sm:$0xff] }
  0xa3   :  { %713 = vmatprep.subr.mxu0 %v568_v40  ;;  %784 = vmatprep.subr.mxu1 %v632_v41  ;;  %v665_v39 = vld [vmem:[#allocation10 + $0x370] sm:$0xff]  ;;  %v600_v40 = vld [vmem:[#allocation10 + $0x168] sm:$0xff] }
  0xa4   :  { %714 = vmatpush1.msra.mxu0 %v567_v42  ;;  %785 = vmatpush1.msra.mxu1 %v631_v43  ;;  %v664_v41 = vld [vmem:[#allocation10 + $0x368] sm:$0xff]  ;;  %v599_v42 = vld [vmem:[#allocation10 + $0x160] sm:$0xff] }
  0xa5   :  { %715 = vmatprep.subr.mxu0 %v566_v44  ;;  %786 = vmatprep.subr.mxu1 %v630_v45  ;;  %v663_v43 = vld [vmem:[#allocation10 + $0x360] sm:$0xff]  ;;  %v598_v44 = vld [vmem:[#allocation10 + $0x158] sm:$0xff] }
  0xa6   :  { %716 = vmatpush1.msra.mxu0 %v565_v46  ;;  %787 = vmatpush1.msra.mxu1 %v629_v47  ;;  %v662_v45 = vld [vmem:[#allocation10 + $0x358] sm:$0xff]  ;;  %v597_v46 = vld [vmem:[#allocation10 + $0x150] sm:$0xff] }
  0xa7   :  { %717 = vmatprep.subr.mxu0 %v564_v48  ;;  %788 = vmatprep.subr.mxu1 %v628_v49  ;;  %v661_v47 = vld [vmem:[#allocation10 + $0x350] sm:$0xff]  ;;  %v596_v48 = vld [vmem:[#allocation10 + $0x148] sm:$0xff] }
  0xa8   :  { %718 = vmatpush1.msra.mxu0 %v563_v50  ;;  %789 = vmatpush1.msra.mxu1 %v627_v51  ;;  %v660_v49 = vld [vmem:[#allocation10 + $0x348] sm:$0xff]  ;;  %v595_v50 = vld [vmem:[#allocation10 + $0x140] sm:$0xff] }
  0xa9   :  { %719 = vmatprep.subr.mxu0 %v562_v52  ;;  %790 = vmatprep.subr.mxu1 %v626_v53  ;;  %v659_v51 = vld [vmem:[#allocation10 + $0x340] sm:$0xff]  ;;  %v594_v52 = vld [vmem:[#allocation10 + $0x138] sm:$0xff] }
  0xaa   :  { %720 = vmatpush1.msra.mxu0 %v561_v54  ;;  %791 = vmatpush1.msra.mxu1 %v625_v55  ;;  %v658_v53 = vld [vmem:[#allocation10 + $0x338] sm:$0xff]  ;;  %v593_v54 = vld [vmem:[#allocation10 + $0x130] sm:$0xff] }
  0xab   :  { %721 = vmatprep.subr.mxu0 %v560_v56  ;;  %792 = vmatprep.subr.mxu1 %v624_v57  ;;  %v657_v55 = vld [vmem:[#allocation10 + $0x330] sm:$0xff]  ;;  %v592_v56 = vld [vmem:[#allocation10 + $0x128] sm:$0xff] }
  0xac   :  { %722 = vmatpush1.msra.mxu0 %v559_v58  ;;  %793 = vmatpush1.msra.mxu1 %v623_v59  ;;  %v656_v57 = vld [vmem:[#allocation10 + $0x328] sm:$0xff]  ;;  %v591_v58 = vld [vmem:[#allocation10 + $0x120] sm:$0xff] }
  0xad   :  { %723 = vmatprep.subr.mxu0 %v558_v60  ;;  %794 = vmatprep.subr.mxu1 %v622_v61  ;;  %v655_v59 = vld [vmem:[#allocation10 + $0x320] sm:$0xff]  ;;  %v590_v60 = vld [vmem:[#allocation10 + $0x118] sm:$0xff] }
  0xae   :  { %724 = vmatpush1.msra.mxu0 %v557_v62  ;;  %795 = vmatpush1.msra.mxu1 %v621_v63  ;;  %v654_v61 = vld [vmem:[#allocation10 + $0x318] sm:$0xff]  ;;  %v589_v62 = vld [vmem:[#allocation10 + $0x110] sm:$0xff] }
  0xaf   :  { %725 = vmatprep.subr.mxu0 %v556_v1  ;;  %796 = vmatprep.subr.mxu1 %v620_v2  ;;  %v653_v63 = vld [vmem:[#allocation10 + $0x310] sm:$0xff]  ;;  %v588_v1 = vld [vmem:[#allocation10 + $0x108] sm:$0xff] }
  0xb0   :  { %726 = vmatpush1.msra.mxu0 %v555_v3  ;;  %797 = vmatpush1.msra.mxu1 %v619_v4  ;;  %v652_v2 = vld [vmem:[#allocation10 + $0x308] sm:$0xff]  ;;  %v587_v3 = vld [vmem:[#allocation10 + $0x100] sm:$0xff] }
  0xb1   :  { %727 = vmatprep.subr.mxu0 %v618_v5  ;;  %798 = vmatprep.subr.mxu1 %v682_v6  ;;  %v651_v4 = vld [vmem:[#allocation10 + $0x300] sm:$0xff]  ;;  %v870_v5 = vld [vmem:[#allocation11 + $0xf8] sm:$0xff]  ;;  %v527_v6 = vlaneseq }
  0xb2   :  { %728 = vmatpush2.msra.mxu0 %v617_v7  ;;  %799 = vmatpush2.msra.mxu1 %v681_v8 }
  0xb3   :  { %729 = vmatprep.subr.mxu0 %v616_v9  ;;  %800 = vmatprep.subr.mxu1 %v680_v10  ;;  %v1253_v7 = vshrl.u32 %v527_v6, 7 }
  0xb4   :  { %730 = vmatpush2.msra.mxu0 %v615_v11  ;;  %801 = vmatpush2.msra.mxu1 %v679_v12  ;;  %v525_v12 = vld [vmem:[%s1283_s4] sm:$0xf] }
  0xb5   :  { %731 = vmatprep.subr.mxu0 %v614_v13  ;;  %802 = vmatprep.subr.mxu1 %v678_v14  ;;  %v529_v10 = vsub.s32 0, %v1253_v7  ;;  %v537_v11 = vsub.s32 2, %v1253_v7  ;;  %v533_v13 = vsub.s32 1, %v1253_v7  ;;  %v541_v14 = vsub.s32 3, %v1253_v7 }
  0xb6   :  { %732 = vmatpush2.msra.mxu0 %v613_v15  ;;  %803 = vmatpush2.msra.mxu1 %v677_v16 }
  0xb7   :  { %733 = vmatprep.subr.mxu0 %v612_v0  ;;  %804 = vmatprep.subr.mxu1 %v676_v17  ;;  %v530_v17 = vrot.slane %v525_v12, %v529_v10 }
  0xb8   :  { %734 = vmatpush2.msra.mxu0 %v611_v18  ;;  %805 = vmatpush2.msra.mxu1 %v675_v19  ;;  %v538_v19 = vrot.slane %v525_v12, %v537_v11 }
  0xb9   :  { %735 = vmatprep.subr.mxu0 %v610_v20  ;;  %806 = vmatprep.subr.mxu1 %v674_v21 }
  0xba   :  { %736 = vmatpush2.msra.mxu0 %v609_v22  ;;  %807 = vmatpush2.msra.mxu1 %v673_v23  ;;  %v534_v22 = vrot.slane %v525_v12, %v533_v13  ;;  %v542_v23 = vrot.slane %v525_v12, %v541_v14 }
  0xbb   :  { %737 = vmatprep.subr.mxu0 %v608_v24  ;;  %808 = vmatprep.subr.mxu1 %v672_v25 }
  0xbc   :  { %738 = vmatpush2.msra.mxu0 %v607_v26  ;;  %809 = vmatpush2.msra.mxu1 %v671_v27 }
  0xbd   :  { %739 = vmatprep.subr.mxu0 %v606_v28  ;;  %810 = vmatprep.subr.mxu1 %v670_v29 }
  0xbe   :  { %740 = vmatpush2.msra.mxu0 %v605_v30  ;;  %811 = vmatpush2.msra.mxu1 %v669_v31 }
  0xbf   :  { %741 = vmatprep.subr.mxu0 %v604_v32  ;;  %812 = vmatprep.subr.mxu1 %v668_v33 }
  0xc0   :  { %742 = vmatpush2.msra.mxu0 %v603_v34  ;;  %813 = vmatpush2.msra.mxu1 %v667_v35 }
  0xc1   :  { %743 = vmatprep.subr.mxu0 %v602_v36  ;;  %814 = vmatprep.subr.mxu1 %v666_v37  ;;  %v854_v36 = vld [vmem:[#allocation11 + $0x78] sm:$0xff]  ;;  %v869_v37 = vld [vmem:[#allocation11 + $0xf0] sm:$0xff] }
  0xc2   :  { %744 = vmatpush2.msra.mxu0 %v601_v38  ;;  %815 = vmatpush2.msra.mxu1 %v665_v39  ;;  %v853_v38 = vld [vmem:[#allocation11 + $0x70] sm:$0xff]  ;;  %v868_v39 = vld [vmem:[#allocation11 + $0xe8] sm:$0xff] }
  0xc3   :  { %745 = vmatprep.subr.mxu0 %v600_v40  ;;  %816 = vmatprep.subr.mxu1 %v664_v41  ;;  %v852_v40 = vld [vmem:[#allocation11 + $0x68] sm:$0xff]  ;;  %v867_v41 = vld [vmem:[#allocation11 + $0xe0] sm:$0xff] }
  0xc4   :  { %746 = vmatpush2.msra.mxu0 %v599_v42  ;;  %817 = vmatpush2.msra.mxu1 %v663_v43  ;;  %v851_v42 = vld [vmem:[#allocation11 + $0x60] sm:$0xff]  ;;  %v866_v43 = vld [vmem:[#allocation11 + $0xd8] sm:$0xff] }
  0xc5   :  { %747 = vmatprep.subr.mxu0 %v598_v44  ;;  %818 = vmatprep.subr.mxu1 %v662_v45  ;;  %v850_v44 = vld [vmem:[#allocation11 + $0x58] sm:$0xff]  ;;  %v865_v45 = vld [vmem:[#allocation11 + $0xd0] sm:$0xff] }
  0xc6   :  { %748 = vmatpush2.msra.mxu0 %v597_v46  ;;  %819 = vmatpush2.msra.mxu1 %v661_v47  ;;  %v849_v46 = vld [vmem:[#allocation11 + $0x50] sm:$0xff]  ;;  %v864_v47 = vld [vmem:[#allocation11 + $0xc8] sm:$0xff] }
  0xc7   :  { %749 = vmatprep.subr.mxu0 %v596_v48  ;;  %820 = vmatprep.subr.mxu1 %v660_v49  ;;  %v848_v48 = vld [vmem:[#allocation11 + $0x48] sm:$0xff]  ;;  %v863_v49 = vld [vmem:[#allocation11 + $0xc0] sm:$0xff] }
  0xc8   :  { %750 = vmatpush2.msra.mxu0 %v595_v50  ;;  %821 = vmatpush2.msra.mxu1 %v659_v51  ;;  %v847_v50 = vld [vmem:[#allocation11 + $0x40] sm:$0xff]  ;;  %v862_v51 = vld [vmem:[#allocation11 + $0xb8] sm:$0xff] }
  0xc9   :  { %751 = vmatprep.subr.mxu0 %v594_v52  ;;  %822 = vmatprep.subr.mxu1 %v658_v53  ;;  %v846_v52 = vld [vmem:[#allocation11 + $0x38] sm:$0xff]  ;;  %v861_v53 = vld [vmem:[#allocation11 + $0xb0] sm:$0xff] }
  0xca   :  { %752 = vmatpush2.msra.mxu0 %v593_v54  ;;  %823 = vmatpush2.msra.mxu1 %v657_v55  ;;  %v845_v54 = vld [vmem:[#allocation11 + $0x30] sm:$0xff]  ;;  %v860_v55 = vld [vmem:[#allocation11 + $0xa8] sm:$0xff] }
  0xcb   :  { %753 = vmatprep.subr.mxu0 %v592_v56  ;;  %824 = vmatprep.subr.mxu1 %v656_v57  ;;  %v844_v56 = vld [vmem:[#allocation11 + $0x28] sm:$0xff]  ;;  %v859_v57 = vld [vmem:[#allocation11 + $0xa0] sm:$0xff] }
  0xcc   :  { %754 = vmatpush2.msra.mxu0 %v591_v58  ;;  %825 = vmatpush2.msra.mxu1 %v655_v59  ;;  %v843_v58 = vld [vmem:[#allocation11 + $0x20] sm:$0xff]  ;;  %v858_v59 = vld [vmem:[#allocation11 + $0x98] sm:$0xff] }
  0xcd   :  { %755 = vmatprep.subr.mxu0 %v590_v60  ;;  %826 = vmatprep.subr.mxu1 %v654_v61  ;;  %v842_v60 = vld [vmem:[#allocation11 + $0x18] sm:$0xff]  ;;  %v857_v61 = vld [vmem:[#allocation11 + $0x90] sm:$0xff] }
  0xce   :  { %756 = vmatpush2.msra.mxu0 %v589_v62  ;;  %827 = vmatpush2.msra.mxu1 %v653_v63  ;;  %v841_v62 = vld [vmem:[#allocation11 + $0x10] sm:$0xff]  ;;  %v856_v63 = vld [vmem:[#allocation11 + $0x88] sm:$0xff] }
  0xcf   :  { %757 = vmatprep.subr.mxu0 %v588_v1  ;;  %828 = vmatprep.subr.mxu1 %v652_v2  ;;  %v840_v1 = vld [vmem:[#allocation11 + $0x8] sm:$0xff]  ;;  %v855_v2 = vld [vmem:[#allocation11 + $0x80] sm:$0xff] }
  0xd0   :  { %758 = vmatpush2.msra.mxu0 %v587_v3  ;;  %829 = vmatpush2.msra.mxu1 %v651_v4  ;;  %v839_v3 = vld [vmem:[#allocation11] sm:$0xff]  ;;  %v683_v4 = vld [vmem:[%s1285_s6] sm:$0x3] }
  0xd1   :  { %968 = vmatprep.subr.mxu0 %v870_v5  ;;  %v688_v5 = vrot.slane %v683_v4, %v529_v10  ;;  %v692_v6 = vrot.slane %v683_v4, %v533_v13  ;;  %v967_v10 = vld [vmem:[%s1287_s8] ss:$0 sm:$0xff] }
 0x12e   :  { %v307_v8 = vpop.f32.mrf.mxu0 }
 0x12f   :  { %v378_v9 = vpop.f32.mrf.mxu1 }
 0x130   :  { %v309_v15 = vpop.f32.mrf.mxu0 }
 0x131   :  { %v380_v16 = vpop.f32.mrf.mxu1 }
 0x150   :  { %v449_v0 = vpop.f32.mrf.mxu0  ;;  %v520_v18 = vpop.f32.mrf.mxu1 }
 0x151   :  { %v450_v20 = vadd.f32 %v449_v0, %v307_v8  ;;  %v521_v21 = vadd.f32 %v520_v18, %v378_v9 }
 0x152   :  { %v451_v24 = vpop.f32.mrf.mxu0  ;;  %v522_v25 = vpop.f32.mrf.mxu1 }
 0x153   :  { %v452_v26 = vadd.f32 %v451_v24, %v309_v15  ;;  %v523_v27 = vadd.f32 %v522_v25, %v380_v16  ;;  %v547_v28 = vadd.f32 %v530_v17, %v450_v20  ;;  %v549_v29 = vadd.f32 %v538_v19, %v521_v21 }
 0x155   :  { %v548_v30 = vadd.f32 %v534_v22, %v452_v26  ;;  %v550_v31 = vadd.f32 %v542_v23, %v523_v27  ;;  %v551_v34 = vmax.f32 %v547_v28, 0.0  ;;  %v553_v35 = vmax.f32 %v549_v29, 0.0 }
 0x157   :  { %v552_v32 = vmax.f32 %v548_v30, 0.0  ;;  %v554_v33 = vmax.f32 %v550_v31, 0.0 }
 0x159   :  { %759 = vmatprep.mubr.f32.mxu0 %v552_v32  ;;  %830 = vmatprep.mubr.f32.mxu1 %v554_v33 }
 0x15a   :  { %760 = vmatmul.mubr.f32.vlgmr.msra.gmra.mxu0 %v551_v34  ;;  %831 = vmatmul.mubr.f32.vlgmr.msra.gmra.mxu1 %v553_v35 }
 0x15b   :  { %969 = vmatpush3.msra.mxu0 %v854_v36 }
 0x15c   :  { %970 = vmatprep.subr.mxu0 %v869_v37 }
 0x15d   :  { %971 = vmatpush3.msra.mxu0 %v853_v38 }
 0x15e   :  { %972 = vmatprep.subr.mxu0 %v868_v39 }
 0x15f   :  { %973 = vmatpush3.msra.mxu0 %v852_v40 }
 0x160   :  { %974 = vmatprep.subr.mxu0 %v867_v41 }
 0x161   :  { %975 = vmatpush3.msra.mxu0 %v851_v42 }
 0x162   :  { %976 = vmatprep.subr.mxu0 %v866_v43 }
 0x163   :  { %977 = vmatpush3.msra.mxu0 %v850_v44 }
 0x164   :  { %978 = vmatprep.subr.mxu0 %v865_v45 }
 0x165   :  { %979 = vmatpush3.msra.mxu0 %v849_v46 }
 0x166   :  { %980 = vmatprep.subr.mxu0 %v864_v47 }
 0x167   :  { %981 = vmatpush3.msra.mxu0 %v848_v48 }
 0x168   :  { %982 = vmatprep.subr.mxu0 %v863_v49 }
 0x169   :  { %983 = vmatpush3.msra.mxu0 %v847_v50 }
 0x16a   :  { %984 = vmatprep.subr.mxu0 %v862_v51 }
 0x16b   :  { %985 = vmatpush3.msra.mxu0 %v846_v52 }
 0x16c   :  { %986 = vmatprep.subr.mxu0 %v861_v53 }
 0x16d   :  { %987 = vmatpush3.msra.mxu0 %v845_v54 }
 0x16e   :  { %988 = vmatprep.subr.mxu0 %v860_v55 }
 0x16f   :  { %989 = vmatpush3.msra.mxu0 %v844_v56 }
 0x170   :  { %990 = vmatprep.subr.mxu0 %v859_v57 }
 0x171   :  { %991 = vmatpush3.msra.mxu0 %v843_v58 }
 0x172   :  { %992 = vmatprep.subr.mxu0 %v858_v59 }
 0x173   :  { %993 = vmatpush3.msra.mxu0 %v842_v60 }
 0x174   :  { %994 = vmatprep.subr.mxu0 %v857_v61 }
 0x175   :  { %995 = vmatpush3.msra.mxu0 %v841_v62 }
 0x176   :  { %996 = vmatprep.subr.mxu0 %v856_v63 }
 0x177   :  { %997 = vmatpush3.msra.mxu0 %v840_v1 }
 0x178   :  { %998 = vmatprep.subr.mxu0 %v855_v2 }
 0x179   :  { %999 = vmatpush3.msra.mxu0 %v839_v3 }
 0x21a   :  { %v761_v8 = vpop.f32.mrf.mxu0  ;;  %v832_v9 = vpop.f32.mrf.mxu1 }
 0x21b   :  { %v762_v11 = vadd.f32 %v761_v8, %v688_v5 }
 0x21c   :  { %v763_v12 = vpop.f32.mrf.mxu0  ;;  %v834_v16 = vpop.f32.mrf.mxu1 }
 0x21d   :  { %v764_v14 = vadd.f32 %v763_v12, %v692_v6  ;;  %v833_v15 = vadd.f32 %v832_v9, %v762_v11 }
 0x21f   :  { %v835_v0 = vadd.f32 %v834_v16, %v764_v14  ;;  %v837_v18 = vmax.f32 %v833_v15, 0.0 }
 0x221   :  { %v838_v17 = vmax.f32 %v835_v0, 0.0 }
 0x223   :  { %942 = vmatprep.mubr.f32.mxu0 %v838_v17 }
 0x224   :  { %943 = vmatmul.mubr.f32.vlgmr.msra.gmra.mxu0 %v837_v18 }
 0x2e4   :  { %v1000_v19 = vpop.f32.mrf.mxu0 }
 0x2e6   :  { %v1001_v20 = vpop.f32.mrf.mxu0 }
 0x2e7   :  { %v1002_v7 = vadd.f32 %v1001_v20, %v1000_v19 }
 0x2e9   :  { %v945_v13 = vadd.f32 %v1002_v7, %v967_v10 }
 0x2eb   :  { %948 = vst [vmem:[#allocation13] sm:$0xff] %v945_v13 }
 0x2ec   :  { %1148 = shalt.err (!%p1145_p6)
}
 0x2ed   :  { %958 = dma.vmem_to_hbm [thread:$0]  %s956_s1, 128, %s1288_s9, [#allocation4]  }
 0x2ee   :  { %1165 = dma.done.wait [#allocation4], 128  }
 0x2ef   :  { %1166 = vsyncadd [#allocation4], 4294967168 }
 0x2f0   :  { %962 = vsyncpa [#allocation3], 1 }
 0x2f1   :  { %963 = vsyncpa [#allocation6], 1 }
 0x2f2   :  { %964 = vsyncpa [#allocation9], 1 }
 0x2f3   :  { %965 = vsyncpa [#allocation12], 1 }
 0x2f4   :  { %966 = vsyncpa [#allocation4], 1 }

</bundles_post_ra>
